<compile_context>
chip_gen: v5e
topology: v5e:2x2
jax: 0.10.0
libtpu: 0.0.40
codegen_flags: <defaults>
</compile_context>

<pallas_src>
import functools

import jax
import jax.numpy as jnp
from jax.experimental import pallas as pl
from jax.experimental.pallas import tpu as pltpu


def _round_up(x, m):
    return (x + m - 1) // m * m


# --------------------------------------------------------------------------- #
# Kernel
# --------------------------------------------------------------------------- #
def _output_layer_kernel(x_ref, w1_ref, b1_ref, w2_ref, b2_ref, o_ref):
    # x arrives as f32; cast to bf16 in-kernel (saves an HBM pass in the wrapper).
    x = x_ref[...].astype(jnp.bfloat16)
    # fc_1: bf16 x bf16 -> f32 accumulation on the MXU.
    h = jnp.dot(x, w1_ref[...], preferred_element_type=jnp.float32)
    h = jnp.maximum(h + b1_ref[...], 0.0)                  # bias + ReLU in f32
    # Dropout: identity in eval/inference mode (PyTorch nn.Dropout in eval()).
    # TODO(synk): training-mode stochastic dropout (pltpu.prng_seed + prng_random_bits mask).
    # TODO(synk): tile the hidden dim here (chunked dot1 -> relu -> dot2-accumulate)
    #             when H_pad >= 512 to keep the f32 intermediate out of VMEM spill.
    h = h.astype(jnp.bfloat16)                              # bf16 for second MXU pass
    # fc_2: bf16 x bf16 -> f32 accumulation, lane-dense (C padded to 128) store.
    o = jnp.dot(h, w2_ref[...], preferred_element_type=jnp.float32)
    o_ref[...] = (o + b2_ref[...]).astype(o_ref.dtype)


# --------------------------------------------------------------------------- #
# One-time parameter preparation (hoisted out of the per-call path)
# --------------------------------------------------------------------------- #
def prepare_output_layer_params(w1, b1, w2, b2):
    """Pad H/C up to multiples of 128 and cast weights to bf16, once.

    w1: (D, H), b1: (H,), w2: (H, C), b2: (C,)  (transposed vs. torch.nn.Linear
    so the kernel computes y = x @ W + b directly on the MXU).
    """
    D, H = w1.shape
    C = w2.shape[1]
    H_pad = _round_up(H, 128)                      # full-width MXU columns
    C_pad = _round_up(C, 128)                      # lane-dense output, no vst.msk

    w1_p = jnp.pad(w1, ((0, 0), (0, H_pad - H))).astype(jnp.bfloat16)          # (D, H_pad)
    b1_p = jnp.pad(b1, (0, H_pad - H)).reshape(1, H_pad).astype(jnp.float32)   # (1, H_pad)
    w2_p = jnp.pad(w2, ((0, H_pad - H), (0, C_pad - C))).astype(jnp.bfloat16)  # (H_pad, C_pad)
    b2_p = jnp.pad(b2, (0, C_pad - C)).reshape(1, C_pad).astype(jnp.float32)   # (1, C_pad)
    return w1_p, b1_p, w2_p, b2_p


# --------------------------------------------------------------------------- #
# Tile plan / VMEM budget
# --------------------------------------------------------------------------- #
_VMEM_BUDGET = 28 * 1024 * 1024  # conservative across v5e/v6e/v7x scoped defaults


def _vmem_bytes(bm, D, H_pad, C_pad):
    return (2 * bm * D * 4          # x tiles, f32, double-buffered
            + D * H_pad * 2         # W1 bf16, single-buffered (Buffered(1))
            + H_pad * C_pad * 2     # W2 bf16, single-buffered (Buffered(1))
            + 2 * bm * C_pad * 4    # out tiles, f32, double-buffered
            + bm * H_pad * 4        # f32 hidden intermediate
            + (H_pad + C_pad) * 4 * 8)  # biases (sublane-padded)


def _tile_plan(B, D, H_pad, C_pad):
    if B <= 8:
        bm = _round_up(max(B, 1), 8)
    else:
        # >= 2 grid steps so ("parallel",) can shard across v7x's 2 TensorCores;
        # cap at 512 (amortizes ~0.35 us per-step overhead on v5e/v6e).
        bm = min(512, _round_up(pl.cdiv(B, 2), 8))
    while bm > 8 and _vmem_bytes(bm, D, H_pad, C_pad) > _VMEM_BUDGET:
        bm = max(8, bm // 2)
    # TODO(synk): if D*H_pad*2 alone exceeds the budget (very long sequences on
    # v7x's 64 MiB part), add a K grid axis over D with an f32 accumulator scratch
    # so W1 streams in (tk, H_pad) slabs instead of being fully resident.
    return bm, _vmem_bytes(bm, D, H_pad, C_pad)


# --------------------------------------------------------------------------- #
# Forward
# --------------------------------------------------------------------------- #
@functools.partial(jax.jit, static_argnames=("num_classes",))
def output_layer_forward(x, w1_p, b1_p, w2_p, b2_p, *, num_classes):
    """x: (B, seq_len, embed_size); pre-padded params from prepare_output_layer_params.

    Returns (B, num_classes) float32 logits (eval-mode dropout == identity).
    """
    B = x.shape[0]
    D = x.shape[1] * x.shape[2]
    H_pad = w1_p.shape[1]
    C_pad = w2_p.shape[1]
    assert w1_p.shape[0] == D, "w1 first dim must equal seq_len*embed_size"

    BM, vmem_needed = _tile_plan(B, D, H_pad, C_pad)
    B_pad = _round_up(B, BM)
    grid = (B_pad // BM,)

    # Flatten + zero-pad batch rows; stays f32 (cast to bf16 happens in-kernel).
    x_flat = x.reshape(B, D).astype(jnp.float32)
    x_flat = jnp.pad(x_flat, ((0, B_pad - B), (0, 0)))

    cost = pl.CostEstimate(
        flops=2 * B_pad * D * H_pad + 2 * B_pad * H_pad * C_pad,
        transcendentals=0,
        bytes_accessed=(B_pad * D * 4 + D * H_pad * 2 + H_pad * C_pad * 2
                        + (H_pad + C_pad) * 4 + B_pad * C_pad * 4),
    )

    out = pl.pallas_call(
        _output_layer_kernel,
        out_shape=jax.ShapeDtypeStruct((B_pad, C_pad), jnp.float32),
        grid=grid,
        in_specs=[
            # x tile: pipelined (double-buffered) over the batch axis.
            pl.BlockSpec((BM, D), lambda i: (i, 0)),
            # Weights / biases: constant index_map -> VMEM-resident, DMA'd once,
            # single-buffered to halve their VMEM footprint.
            pl.BlockSpec((D, H_pad), lambda i: (0, 0), pipeline_mode=pl.Buffered(1)),
            pl.BlockSpec((1, H_pad), lambda i: (0, 0), pipeline_mode=pl.Buffered(1)),
            pl.BlockSpec((H_pad, C_pad), lambda i: (0, 0), pipeline_mode=pl.Buffered(1)),
            pl.BlockSpec((1, C_pad), lambda i: (0, 0), pipeline_mode=pl.Buffered(1)),
        ],
        out_specs=pl.BlockSpec((BM, C_pad), lambda i: (i, 0)),
        compiler_params=pltpu.CompilerParams(
            dimension_semantics=("parallel",),              # megacore over batch tiles
            vmem_limit_bytes=int(vmem_needed) + (8 << 20),  # explicit budget + headroom
        ),
        cost_estimate=cost,
    )(x_flat, w1_p, b1_p, w2_p, b2_p)

    # Drop batch/class padding before any downstream softmax/argmax.
    return out[:B, :num_classes]


if __name__ == "__main__":
    # Module hyper-params (small, consistent with the forward pass).
    batch = 2
    seq_len = 8
    embed_size = 32
    ff_hidden_size = 64
    num_classes = 2

    D = embed_size * seq_len

    key = jax.random.PRNGKey(0)
    kx, kw1, kb1, kw2, kb2 = jax.random.split(key, 5)

    # Deterministic parameter init (uniform like torch Linear default, scaled).
    x = jax.random.normal(kx, (batch, seq_len, embed_size), dtype=jnp.float32)
    w1 = jax.random.uniform(kw1, (D, ff_hidden_size), jnp.float32,
                            minval=-1.0, maxval=1.0) / jnp.sqrt(D)
    b1 = jax.random.uniform(kb1, (ff_hidden_size,), jnp.float32,
                            minval=-1.0, maxval=1.0) / jnp.sqrt(D)
    w2 = jax.random.uniform(kw2, (ff_hidden_size, num_classes), jnp.float32,
                            minval=-1.0, maxval=1.0) / jnp.sqrt(ff_hidden_size)
    b2 = jax.random.uniform(kb2, (num_classes,), jnp.float32,
                            minval=-1.0, maxval=1.0) / jnp.sqrt(ff_hidden_size)

    # One-time parameter preparation (pad + bf16 cast hoisted out of per-call path).
    w1_p, b1_p, w2_p, b2_p = prepare_output_layer_params(w1, b1, w2, b2)
    w1_p, b1_p, w2_p, b2_p = jax.block_until_ready((w1_p, b1_p, w2_p, b2_p))

    out = output_layer_forward(x, w1_p, b1_p, w2_p, b2_p, num_classes=num_classes)
    out = jax.block_until_ready(out)

    # Reference check in plain JAX (eval-mode dropout == identity).
    # bf16 MXU inputs with f32 accumulation -> relaxed tolerance vs. pure-f32 ref.
    ref = jnp.maximum(x.reshape(batch, D) @ w1 + b1, 0.0) @ w2 + b2
    assert out.shape == (batch, num_classes)
    assert jnp.allclose(out, ref, atol=2e-2, rtol=2e-2)

    print("KERNEL_OK")
</pallas_src>

<mosaic_0001>
module attributes {stable_mosaic.version = 11 : i64} {
  func.func @_output_layer_kernel(%arg0: i32, %arg1: memref<8x256xf32, #tpu.memory_space<vmem>>, %arg2: memref<256x128xbf16, #tpu.memory_space<vmem>>, %arg3: memref<1x128xf32, #tpu.memory_space<vmem>>, %arg4: memref<128x128xbf16, #tpu.memory_space<vmem>>, %arg5: memref<1x128xf32, #tpu.memory_space<vmem>>, %arg6: memref<8x128xf32, #tpu.memory_space<vmem>>) attributes {dimension_semantics = [#tpu.dimension_semantics<parallel>], iteration_bounds = array<i64: 1>, scalar_prefetch = 0 : i64, scratch_operands = 0 : i64, tpu.core_type = #tpu.core_type<tc>, window_params = [{transform_indices = @transform_0, window_bounds = array<i64: 8, 256>}, {pipeline_mode = #tpu.pipeline_mode<synchronous>, transform_indices = @transform_1, window_bounds = array<i64: 256, 128>}, {pipeline_mode = #tpu.pipeline_mode<synchronous>, transform_indices = @transform_2, window_bounds = array<i64: 1, 128>}, {pipeline_mode = #tpu.pipeline_mode<synchronous>, transform_indices = @transform_3, window_bounds = array<i64: 128, 128>}, {pipeline_mode = #tpu.pipeline_mode<synchronous>, transform_indices = @transform_4, window_bounds = array<i64: 1, 128>}, {transform_indices = @transform_5, window_bounds = array<i64: 8, 128>}]} {
    %c0 = arith.constant 0 : index
    %c0_0 = arith.constant 0 : index
    %0 = vector.load %arg1[%c0, %c0_0] : memref<8x256xf32, #tpu.memory_space<vmem>>, vector<8x256xf32>
    %1 = arith.truncf %0 : vector<8x256xf32> to vector<8x256xbf16>
    %c0_1 = arith.constant 0 : index
    %c0_2 = arith.constant 0 : index
    %2 = vector.load %arg2[%c0_1, %c0_2] : memref<256x128xbf16, #tpu.memory_space<vmem>>, vector<256x128xbf16>
    %cst = arith.constant dense<0.000000e+00> : vector<8x128xf32>
    %3 = tpu.matmul %1, %2, %cst {dimension_numbers = #tpu.dot_dimension_numbers<[1], [0], [0], [1], [0, 0, 1, 1], [], []>} : vector<8x256xbf16>, vector<256x128xbf16>, vector<8x128xf32> -> vector<8x128xf32>
    %c0_3 = arith.constant 0 : index
    %c0_4 = arith.constant 0 : index
    %4 = vector.load %arg3[%c0_3, %c0_4] : memref<1x128xf32, #tpu.memory_space<vmem>>, vector<1x128xf32>
    %5 = vector.broadcast %4 : vector<1x128xf32> to vector<8x128xf32>
    %6 = arith.addf %3, %5 : vector<8x128xf32>
    %cst_5 = arith.constant 0.000000e+00 : f32
    %7 = vector.broadcast %cst_5 : f32 to vector<8x128xf32>
    %8 = arith.maximumf %6, %7 : vector<8x128xf32>
    %9 = arith.truncf %8 : vector<8x128xf32> to vector<8x128xbf16>
    %c0_6 = arith.constant 0 : index
    %c0_7 = arith.constant 0 : index
    %10 = vector.load %arg4[%c0_6, %c0_7] : memref<128x128xbf16, #tpu.memory_space<vmem>>, vector<128x128xbf16>
    %cst_8 = arith.constant dense<0.000000e+00> : vector<8x128xf32>
    %11 = tpu.matmul %9, %10, %cst_8 {dimension_numbers = #tpu.dot_dimension_numbers<[1], [0], [0], [1], [0, 0, 1, 1], [], []>} : vector<8x128xbf16>, vector<128x128xbf16>, vector<8x128xf32> -> vector<8x128xf32>
    %c0_9 = arith.constant 0 : index
    %c0_10 = arith.constant 0 : index
    %12 = vector.load %arg5[%c0_9, %c0_10] : memref<1x128xf32, #tpu.memory_space<vmem>>, vector<1x128xf32>
    %13 = vector.broadcast %12 : vector<1x128xf32> to vector<8x128xf32>
    %14 = arith.addf %11, %13 : vector<8x128xf32>
    %c0_11 = arith.constant 0 : index
    %c0_12 = arith.constant 0 : index
    %15 = vector.load %arg6[%c0_11, %c0_12] : memref<8x128xf32, #tpu.memory_space<vmem>>, vector<8x128xf32>
    tpu.vector_store %arg6[%c0_11, %c0_12], %14 {strides = array<i32>} : memref<8x128xf32, #tpu.memory_space<vmem>>, vector<8x128xf32>,
    return
  }
  func.func @transform_0(%arg0: i32) -> (i32, i32) {
    %c0_i32 = arith.constant 0 : i32
    %c0_i32_0 = arith.constant 0 : i32
    return %arg0, %c0_i32 : i32, i32
  }
  func.func @transform_1(%arg0: i32) -> (i32, i32) {
    %c0_i32 = arith.constant 0 : i32
    %c0_i32_0 = arith.constant 0 : i32
    %c0_i32_1 = arith.constant 0 : i32
    return %c0_i32, %c0_i32_0 : i32, i32
  }
  func.func @transform_2(%arg0: i32) -> (i32, i32) {
    %c0_i32 = arith.constant 0 : i32
    %c0_i32_0 = arith.constant 0 : i32
    %c0_i32_1 = arith.constant 0 : i32
    return %c0_i32, %c0_i32_0 : i32, i32
  }
  func.func @transform_3(%arg0: i32) -> (i32, i32) {
    %c0_i32 = arith.constant 0 : i32
    %c0_i32_0 = arith.constant 0 : i32
    %c0_i32_1 = arith.constant 0 : i32
    return %c0_i32, %c0_i32_0 : i32, i32
  }
  func.func @transform_4(%arg0: i32) -> (i32, i32) {
    %c0_i32 = arith.constant 0 : i32
    %c0_i32_0 = arith.constant 0 : i32
    %c0_i32_1 = arith.constant 0 : i32
    return %c0_i32, %c0_i32_0 : i32, i32
  }
  func.func @transform_5(%arg0: i32) -> (i32, i32) {
    %c0_i32 = arith.constant 0 : i32
    %c0_i32_0 = arith.constant 0 : i32
    return %arg0, %c0_i32 : i32, i32
  }
}

</mosaic_0001>

<bundles_post_ra>
// kernel: output_layer_forward.1
= control target key start
LH: loop header
LB: loop body
LE: loop exit
PB: predicated region body
PF: predicated region fallthrough
CT: control target
= control target key end

     0   :  { %10 = vsyncpa [#allocation3], 0  ;;  %s537_s0 = inlined_call_operand.vmem [shape: f32[8,256], index: 0, kind: input, shape index: {}]   ;;  %s538_s1 = inlined_call_operand.hbm [shape: bf16[256,128], index: 1, kind: input, shape index: {}]   ;;  %s539_s2 = inlined_call_operand.vmem [shape: f32[1,128], index: 2, kind: input, shape index: {}]   ;;  %s540_s3 = inlined_call_operand.hbm [shape: bf16[128,128], index: 3, kind: input, shape index: {}]   ;;  %s541_s4 = inlined_call_operand.vmem [shape: f32[1,128], index: 4, kind: input, shape index: {}]   ;;  %s542_s5 = inlined_call_operand.vmem [shape: f32[8,128], index: 5, kind: output, shape index: {}]  }
   0x1   :  { %s18_s20 = sshll.u32 %s538_s1, 4  ;;  %s19_s20 = int_to_ptr.hbm [resolvable:$true] %s18_s20 }
   0x2   :  { %11 = vsyncpa [#allocation5], 0  ;;  %s482_s21 = smov [#allocation2]   ;;  %s33_s25 = sshll.u32 %s540_s3, 4  ;;  %s34_s25 = int_to_ptr.hbm [resolvable:$true] %s33_s25 }
   0x3   :  { %s20_s22 = sshll.u32 %s482_s21, 4  ;;  %s483_s26 = smov 64   ;;  %s21_s22 = int_to_ptr.vmem [resolvable:$true] %s20_s22 }
   0x4   :  { %s484_s27 = smov 4   ;;  %s485_s28 = smov [#allocation4]  }
   0x5   :  { %26 = dma.hbm_to_vmem [thread:$0]  %s19_s20, 2048, %s21_s22, [#allocation3], %s483_s26, %s483_s26, %s484_s27  }
   0x6   :  { %s35_s29 = sshll.u32 %s485_s28, 4  ;;  %s36_s29 = int_to_ptr.vmem [resolvable:$true] %s35_s29 }
   0x7   :  { %41 = dma.hbm_to_vmem [thread:$0]  %s34_s25, 1024, %s36_s29, [#allocation5], %s483_s26, %s483_s26, %s484_s27  }
   0x8   :  { %478 = dma.done.wait [#allocation3], 2048  }
   0x9   :  { %479 = vsyncadd [#allocation3], 4294965248 }
   0xa   :  { %480 = dma.done.wait [#allocation5], 1024  }
   0xb   :  { %481 = vsyncadd [#allocation5], 4294966272  ;;  %v407_v0 = vld [vmem:[#allocation2 + $0x38] sm:$0xff]  ;;  %v406_v2 = vld [vmem:[#allocation2 + $0x30] sm:$0xff] }
   0xc   :  { %v415_v1 = vld [vmem:[#allocation2 + $0x78] sm:$0xff]  ;;  %188 = vmatpush.bf16.msra.mxu0 %v407_v0  ;;  %v414_v3 = vld [vmem:[#allocation2 + $0x70] sm:$0xff]  ;;  %v405_v4 = vld [vmem:[#allocation2 + $0x28] sm:$0xff] }
   0xd   :  { %201 = vmatpush.bf16.msra.mxu1 %v415_v1  ;;  %v413_v5 = vld [vmem:[#allocation2 + $0x68] sm:$0xff]  ;;  %v423_v6 = vld [vmem:[#allocation4 + $0x38] sm:$0xff]  ;;  %v422_v7 = vld [vmem:[#allocation4 + $0x30] sm:$0xff] }
   0xe   :  { %284 = vmatpush.bf16.msra.mxu2 %v423_v6  ;;  %v404_v8 = vld [vmem:[#allocation2 + $0x20] sm:$0xff]  ;;  %v421_v10 = vld [vmem:[#allocation4 + $0x28] sm:$0xff]  ;;  %v403_v11 = vld [vmem:[#allocation2 + $0x18] sm:$0xff] }
   0xf   :  { %v412_v9 = vld [vmem:[#allocation2 + $0x60] sm:$0xff]  ;;  %v411_v12 = vld [vmem:[#allocation2 + $0x58] sm:$0xff]  ;;  %v402_v14 = vld [vmem:[#allocation2 + $0x10] sm:$0xff] }
  0x10   :  { %189 = vmatpush.bf16.msra.mxu0 %v406_v2  ;;  %v420_v13 = vld [vmem:[#allocation4 + $0x20] sm:$0xff]  ;;  %v410_v15 = vld [vmem:[#allocation2 + $0x50] sm:$0xff]  ;;  %v419_v16 = vld [vmem:[#allocation4 + $0x18] sm:$0xff] }
  0x11   :  { %202 = vmatpush.bf16.msra.mxu1 %v414_v3  ;;  %v401_v17 = vld [vmem:[#allocation2 + $0x8] sm:$0xff]  ;;  %v418_v19 = vld [vmem:[#allocation4 + $0x10] sm:$0xff]  ;;  %v400_v20 = vld [vmem:[#allocation2] sm:$0xff] }
  0x12   :  { %285 = vmatpush.bf16.msra.mxu2 %v422_v7  ;;  %v409_v18 = vld [vmem:[#allocation2 + $0x48] sm:$0xff]  ;;  %v408_v21 = vld [vmem:[#allocation2 + $0x40] sm:$0xff] }
  0x13   :  { %v52_v22 = vld [vmem:[%s537_s0] sm:$0xff]  ;;  %v53_v23 = vld [vmem:[%s537_s0 + $0x8] sm:$0xff] }
  0x14   :  { %190 = vmatpush.bf16.msra.mxu0 %v405_v4  ;;  %v54_v24 = vpack.c.bf16 %v52_v22, %v52_v22  ;;  %v55_v25 = vpack.c.bf16 %v53_v23, %v53_v23  ;;  %v417_v26 = vld [vmem:[#allocation4 + $0x8] sm:$0xff]  ;;  %v416_v27 = vld [vmem:[#allocation4] sm:$0xff] }
  0x15   :  { %203 = vmatpush.bf16.msra.mxu1 %v413_v5  ;;  %v428_v28 = vld [vmem:[%s539_s2] ss:$0 sm:$0xff] }
  0x16   :  { %286 = vmatpush.bf16.msra.mxu2 %v421_v10  ;;  %v429_v37 = vld [vmem:[%s541_s4] ss:$0 sm:$0xff] }
  0x18   :  { %191 = vmatpush.bf16.msra.mxu0 %v404_v8 }
  0x19   :  { %204 = vmatpush.bf16.msra.mxu1 %v412_v9 }
  0x1a   :  { %287 = vmatpush.bf16.msra.mxu2 %v420_v13 }
  0x1c   :  { %192 = vmatpush.bf16.msra.mxu0 %v403_v11 }
  0x1d   :  { %205 = vmatpush.bf16.msra.mxu1 %v411_v12 }
  0x1e   :  { %288 = vmatpush.bf16.msra.mxu2 %v419_v16 }
  0x20   :  { %193 = vmatpush.bf16.msra.mxu0 %v402_v14 }
  0x21   :  { %206 = vmatpush.bf16.msra.mxu1 %v410_v15 }
  0x22   :  { %289 = vmatpush.bf16.msra.mxu2 %v418_v19 }
  0x24   :  { %194 = vmatpush.bf16.msra.mxu0 %v401_v17 }
  0x25   :  { %207 = vmatpush.bf16.msra.mxu1 %v409_v18 }
  0x26   :  { %290 = vmatpush.bf16.msra.mxu2 %v417_v26 }
  0x28   :  { %195 = vmatpush.bf16.msra.mxu0 %v400_v20 }
  0x29   :  { %208 = vmatpush.bf16.msra.mxu1 %v408_v21 }
  0x2a   :  { %291 = vmatpush.bf16.msra.mxu2 %v416_v27 }
  0x2b   :  { %196 = vmatmul.bf16.vlgmr.msra.gmra.mxu0 %v54_v24 }
  0x2c   :  { %209 = vmatmul.bf16.vlgmr.msra.gmra.mxu1 %v55_v25 }
  0xa8   :  { %v197_v29 = vpop.f32.mrf.mxu0 }
  0xa9   :  { %v210_v30 = vpop.f32.mrf.mxu1  ;;  %v198_v31 = vadd.f32 %v428_v28, %v197_v29 }
  0xab   :  { %v211_v32 = vadd.f32 %v210_v30, %v198_v31 }
  0xad   :  { %v214_v33 = vmax.f32 %v211_v32, 0.0 }
  0xaf   :  { %v215_v34 = vpack.c.bf16 %v214_v33, %v214_v33 }
  0xb0   :  { %v199_v35 = vpop.f32.mrf.mxu0 }
  0xb1   :  { %v212_v36 = vpop.f32.mrf.mxu1  ;;  %292 = vmatmul.bf16.vlgmr.msra.gmra.mxu2 %v215_v34 }
 0x134   :  { %v293_v38 = vpop.f32.mrf.mxu2 }
 0x135   :  { %v294_v39 = vadd.f32 %v429_v37, %v293_v38 }
 0x137   :  { %297 = vst [vmem:[%s542_s5] sm:$0xff] %v294_v39 }
 0x13c   :  { %v295_v40 = vpop.f32.mrf.mxu2 }
 0x13d   :  { %302 = vsyncpa [#allocation3], 1 }
 0x13e   :  { %303 = vsyncpa [#allocation5], 1 }

</bundles_post_ra>
